<compile_context>
chip_gen: v7x
topology: tpu7x:2x2x1
jax: 0.10.0
libtpu: 0.0.40
codegen_flags: <defaults>
</compile_context>

<pallas_src>
import jax
import jax.numpy as jnp
from jax import lax
from jax.experimental import pallas as pl
from jax.experimental.pallas import tpu as pltpu


def _round_up(x, m):
    return (x + m - 1) // m * m


def ffn_kernel(x_ref, w1_ref, b1_ref, w2_ref, b2_ref, o_ref, acc_ref):
    # x_ref:  (tm, Ep)  bf16 activation tile (streams over M)
    # w1_ref: (th, Ep)  bf16 fc1 weight chunk, PyTorch (out, in) layout
    # b1_ref: (1,  th)  f32 fc1 bias chunk
    # w2_ref: (Ep, th)  bf16 fc2 weight chunk, PyTorch (out, in) layout
    # b2_ref: (1,  Ep)  f32 fc2 bias (resident)
    # o_ref:  (tm, Ep)  output tile (resident across the H grid axis)
    # acc_ref:(tm, Ep)  f32 accumulator scratch
    j = pl.program_id(1)

    @pl.when(j == 0)
    def _():
        acc_ref[...] = jnp.zeros_like(acc_ref)

    # fc1 chunk: x @ w1.T  -> contract last dims, f32 accumulate on the MXU.
    h = lax.dot_general(
        x_ref[...], w1_ref[...],
        dimension_numbers=(((1,), (1,)), ((), ())),
        preferred_element_type=jnp.float32,
    )
    h = jnp.maximum(h + b1_ref[...], 0.0)          # bias + ReLU in f32 (VPU)

    # fc2 partial contribution of this H chunk: h @ w2.T, accumulate in f32.
    acc_ref[...] += lax.dot_general(
        h.astype(w2_ref.dtype), w2_ref[...],
        dimension_numbers=(((1,), (1,)), ((), ())),
        preferred_element_type=jnp.float32,
    )

    @pl.when(j == pl.num_programs(1) - 1)
    def _():
        o_ref[...] = (acc_ref[...] + b2_ref[...]).astype(o_ref.dtype)


def feed_forward(x, w1, b1, w2, b2, *, tm_max=512, th_max=512):
    """FeedForward: fc2(relu(fc1(x))).

    x:  (B, S, E)
    w1: (H, E), b1: (H,)  -- PyTorch nn.Linear layout (out_features, in_features)
    w2: (E, H), b2: (E,)
    """
    B, S, E = x.shape
    H = w1.shape[0]
    M = B * S
    out_dtype = x.dtype

    # Lane-dense padded feature dims (multiples of 128).
    Ep = _round_up(E, 128)
    Hp = _round_up(H, 128)

    # M tiling: largest tile <= tm_max; pad M so it divides evenly.
    tm = tm_max if M >= tm_max else _round_up(M, 8)
    Mp = _round_up(M, tm)

    # H tiling: largest 128-multiple <= th_max that divides Hp.
    th = Hp
    for cand in (th_max, 256, 128):
        c = _round_up(min(cand, Hp), 128)
        if Hp % c == 0:
            th = c
            break

    cdt = jnp.bfloat16  # MXU compute dtype (f32 accumulation inside the kernel)

    # Zero-pad / cast once per call.
    # TODO(synk): in a real model, pre-pad + pre-cast the weights once at init.
    x2 = jnp.zeros((Mp, Ep), cdt).at[:M, :E].set(x.reshape(M, E).astype(cdt))
    w1p = jnp.zeros((Hp, Ep), cdt).at[:H, :E].set(w1.astype(cdt))
    w2p = jnp.zeros((Ep, Hp), cdt).at[:E, :H].set(w2.astype(cdt))
    b1p = jnp.zeros((1, Hp), jnp.float32).at[0, :H].set(b1.astype(jnp.float32))
    b2p = jnp.zeros((1, Ep), jnp.float32).at[0, :E].set(b2.astype(jnp.float32))

    grid = (Mp // tm, Hp // th)

    # Rough VMEM budget (double-buffered tiles + accumulator) with 2x headroom,
    # clamped so it stays valid on v5e (16 MiB default) through v7x (64 MiB phys).
    vmem_bytes = (
        2 * tm * Ep * 2                                   # x tiles (bf16, 2 bufs)
        + 2 * tm * Ep * jnp.dtype(out_dtype).itemsize     # out tiles (2 bufs)
        + 2 * 2 * th * Ep * 2                             # w1 + w2 blocks (2 bufs)
        + tm * Ep * 4                                     # f32 accumulator
        + 4 * (th + Ep) * 4                               # biases
    )
    vmem_limit = int(min(max(2 * vmem_bytes, 16 * 1024 * 1024), 64 * 1024 * 1024))

    cost = pl.CostEstimate(
        flops=4 * Mp * Ep * Hp,                           # two matmuls
        transcendentals=0,
        bytes_accessed=(x2.size * 2 + w1p.size * 2 + w2p.size * 2
                        + Mp * Ep * jnp.dtype(out_dtype).itemsize),
    )

    out = pl.pallas_call(
        ffn_kernel,
        out_shape=jax.ShapeDtypeStruct((Mp, Ep), out_dtype),
        grid_spec=pltpu.PrefetchScalarGridSpec(
            num_scalar_prefetch=0,
            grid=grid,
            in_specs=[
                pl.BlockSpec((tm, Ep), lambda i, j: (i, 0)),   # x: streams over M
                pl.BlockSpec((th, Ep), lambda i, j: (j, 0)),   # w1 chunk over H
                pl.BlockSpec((1, th), lambda i, j: (0, j)),    # b1 chunk over H
                pl.BlockSpec((Ep, th), lambda i, j: (0, j)),   # w2 chunk over H
                pl.BlockSpec((1, Ep), lambda i, j: (0, 0)),    # b2: resident
            ],
            out_specs=pl.BlockSpec((tm, Ep), lambda i, j: (i, 0)),
            scratch_shapes=[pltpu.VMEM((tm, Ep), jnp.float32)],
        ),
        compiler_params=pltpu.CompilerParams(
            dimension_semantics=("parallel", "arbitrary"),
            vmem_limit_bytes=vmem_limit,
        ),
        cost_estimate=cost,
    )(x2, w1p, b1p, w2p, b2p)

    # Slice off M padding (last tile) and feature padding, restore (B, S, E).
    return out[:M, :E].reshape(B, S, E)


if __name__ == "__main__":
    # Small shapes implied by the module: embed_dim=32, hidden_dim=64, batch=2, seq=8.
    B, S, E, H = 2, 8, 32, 64

    key = jax.random.PRNGKey(0)
    kx, kw1, kb1, kw2, kb2 = jax.random.split(key, 5)

    x = jax.random.normal(kx, (B, S, E), dtype=jnp.float32)
    # PyTorch nn.Linear stores weight as (out_features, in_features).
    w1 = jax.random.normal(kw1, (H, E), dtype=jnp.float32) * (1.0 / jnp.sqrt(E))
    b1 = jax.random.normal(kb1, (H,), dtype=jnp.float32) * 0.01
    w2 = jax.random.normal(kw2, (E, H), dtype=jnp.float32) * (1.0 / jnp.sqrt(H))
    b2 = jax.random.normal(kb2, (E,), dtype=jnp.float32) * 0.01

    out = feed_forward(x, w1, b1, w2, b2)
    jax.block_until_ready(out)

    # Pure-JAX f32 reference; tolerance loosened for bf16 MXU inputs.
    ref = jnp.maximum(x @ w1.T + b1, 0.0) @ w2.T + b2
    assert out.shape == (B, S, E)
    assert jnp.allclose(out, ref, atol=5e-2, rtol=5e-2), "mismatch vs reference"

    print("KERNEL_OK")
</pallas_src>

<mosaic_0001>
module attributes {stable_mosaic.version = 11 : i64} {
  func.func @ffn_kernel(%arg0: i32, %arg1: i32, %arg2: memref<16x128xbf16, #tpu.memory_space<vmem>>, %arg3: memref<128x128xbf16, #tpu.memory_space<vmem>>, %arg4: memref<1x128xf32, #tpu.memory_space<vmem>>, %arg5: memref<128x128xbf16, #tpu.memory_space<vmem>>, %arg6: memref<1x128xf32, #tpu.memory_space<vmem>>, %arg7: memref<16x128xf32, #tpu.memory_space<vmem>>, %arg8: memref<16x128xf32, #tpu.memory_space<vmem>>) attributes {dimension_semantics = [#tpu.dimension_semantics<parallel>, #tpu.dimension_semantics<arbitrary>], iteration_bounds = array<i64: 1, 1>, scalar_prefetch = 0 : i64, scratch_operands = 1 : i64, tpu.core_type = #tpu.core_type<tc>, window_params = [{transform_indices = @transform_0, window_bounds = array<i64: 16, 128>}, {transform_indices = @transform_1, window_bounds = array<i64: 128, 128>}, {transform_indices = @transform_2, window_bounds = array<i64: 1, 128>}, {transform_indices = @transform_3, window_bounds = array<i64: 128, 128>}, {pipeline_mode = #tpu.pipeline_mode<synchronous>, transform_indices = @transform_4, window_bounds = array<i64: 1, 128>}, {transform_indices = @transform_5, window_bounds = array<i64: 16, 128>}]} {
    %c0_i32 = arith.constant 0 : i32
    %0 = arith.cmpi eq, %arg1, %c0_i32 : i32
    %1 = arith.extui %0 : i1 to i32
    %c0_i32_0 = arith.constant 0 : i32
    %2 = arith.cmpi ne, %1, %c0_i32_0 : i32
    scf.if %2 {
      %cst_16 = arith.constant 0.000000e+00 : f32
      %20 = vector.broadcast %cst_16 : f32 to vector<16x128xf32>
      %c0_17 = arith.constant 0 : index
      %c0_18 = arith.constant 0 : index
      %21 = vector.load %arg8[%c0_17, %c0_18] : memref<16x128xf32, #tpu.memory_space<vmem>>, vector<16x128xf32>
      tpu.vector_store %arg8[%c0_17, %c0_18], %20 {strides = array<i32>} : memref<16x128xf32, #tpu.memory_space<vmem>>, vector<16x128xf32>,
    } else {
    }
    %c0 = arith.constant 0 : index
    %c0_1 = arith.constant 0 : index
    %3 = vector.load %arg2[%c0, %c0_1] : memref<16x128xbf16, #tpu.memory_space<vmem>>, vector<16x128xbf16>
    %c0_2 = arith.constant 0 : index
    %c0_3 = arith.constant 0 : index
    %4 = vector.load %arg3[%c0_2, %c0_3] : memref<128x128xbf16, #tpu.memory_space<vmem>>, vector<128x128xbf16>
    %cst = arith.constant dense<0.000000e+00> : vector<16x128xf32>
    %5 = tpu.matmul %3, %4, %cst {dimension_numbers = #tpu.dot_dimension_numbers<[1], [1], [0], [0], [0, 0, 1, 0], [], []>} : vector<16x128xbf16>, vector<128x128xbf16>, vector<16x128xf32> -> vector<16x128xf32>
    %c0_4 = arith.constant 0 : index
    %c0_5 = arith.constant 0 : index
    %6 = vector.load %arg4[%c0_4, %c0_5] : memref<1x128xf32, #tpu.memory_space<vmem>>, vector<1x128xf32>
    %7 = vector.broadcast %6 : vector<1x128xf32> to vector<16x128xf32>
    %8 = arith.addf %5, %7 : vector<16x128xf32>
    %cst_6 = arith.constant 0.000000e+00 : f32
    %9 = vector.broadcast %cst_6 : f32 to vector<16x128xf32>
    %10 = arith.maximumf %8, %9 : vector<16x128xf32>
    %c0_7 = arith.constant 0 : index
    %c0_8 = arith.constant 0 : index
    %11 = vector.load %arg8[%c0_7, %c0_8] : memref<16x128xf32, #tpu.memory_space<vmem>>, vector<16x128xf32>
    %12 = arith.truncf %10 : vector<16x128xf32> to vector<16x128xbf16>
    %c0_9 = arith.constant 0 : index
    %c0_10 = arith.constant 0 : index
    %13 = vector.load %arg5[%c0_9, %c0_10] : memref<128x128xbf16, #tpu.memory_space<vmem>>, vector<128x128xbf16>
    %cst_11 = arith.constant dense<0.000000e+00> : vector<16x128xf32>
    %14 = tpu.matmul %12, %13, %cst_11 {dimension_numbers = #tpu.dot_dimension_numbers<[1], [1], [0], [0], [0, 0, 1, 0], [], []>} : vector<16x128xbf16>, vector<128x128xbf16>, vector<16x128xf32> -> vector<16x128xf32>
    %15 = arith.addf %11, %14 : vector<16x128xf32>
    %c0_12 = arith.constant 0 : index
    %c0_13 = arith.constant 0 : index
    %16 = vector.load %arg8[%c0_12, %c0_13] : memref<16x128xf32, #tpu.memory_space<vmem>>, vector<16x128xf32>
    tpu.vector_store %arg8[%c0_12, %c0_13], %15 {strides = array<i32>} : memref<16x128xf32, #tpu.memory_space<vmem>>, vector<16x128xf32>,
    %c0_i32_14 = arith.constant 0 : i32
    %17 = arith.cmpi eq, %arg1, %c0_i32_14 : i32
    %18 = arith.extui %17 : i1 to i32
    %c0_i32_15 = arith.constant 0 : i32
    %19 = arith.cmpi ne, %18, %c0_i32_15 : i32
    scf.if %19 {
      %c0_16 = arith.constant 0 : index
      %c0_17 = arith.constant 0 : index
      %20 = vector.load %arg8[%c0_16, %c0_17] : memref<16x128xf32, #tpu.memory_space<vmem>>, vector<16x128xf32>
      %c0_18 = arith.constant 0 : index
      %c0_19 = arith.constant 0 : index
      %21 = vector.load %arg6[%c0_18, %c0_19] : memref<1x128xf32, #tpu.memory_space<vmem>>, vector<1x128xf32>
      %22 = vector.broadcast %21 : vector<1x128xf32> to vector<16x128xf32>
      %23 = arith.addf %20, %22 : vector<16x128xf32>
      %c0_20 = arith.constant 0 : index
      %c0_21 = arith.constant 0 : index
      %24 = vector.load %arg7[%c0_20, %c0_21] : memref<16x128xf32, #tpu.memory_space<vmem>>, vector<16x128xf32>
      tpu.vector_store %arg7[%c0_20, %c0_21], %23 {strides = array<i32>} : memref<16x128xf32, #tpu.memory_space<vmem>>, vector<16x128xf32>,
    } else {
    }
    return
  }
  func.func @transform_0(%arg0: i32, %arg1: i32) -> (i32, i32) {
    %c0_i32 = arith.constant 0 : i32
    %c0_i32_0 = arith.constant 0 : i32
    return %arg0, %c0_i32 : i32, i32
  }
  func.func @transform_1(%arg0: i32, %arg1: i32) -> (i32, i32) {
    %c0_i32 = arith.constant 0 : i32
    %c0_i32_0 = arith.constant 0 : i32
    return %arg1, %c0_i32 : i32, i32
  }
  func.func @transform_2(%arg0: i32, %arg1: i32) -> (i32, i32) {
    %c0_i32 = arith.constant 0 : i32
    %c0_i32_0 = arith.constant 0 : i32
    return %c0_i32, %arg1 : i32, i32
  }
  func.func @transform_3(%arg0: i32, %arg1: i32) -> (i32, i32) {
    %c0_i32 = arith.constant 0 : i32
    %c0_i32_0 = arith.constant 0 : i32
    return %c0_i32, %arg1 : i32, i32
  }
  func.func @transform_4(%arg0: i32, %arg1: i32) -> (i32, i32) {
    %c0_i32 = arith.constant 0 : i32
    %c0_i32_0 = arith.constant 0 : i32
    %c0_i32_1 = arith.constant 0 : i32
    return %c0_i32, %c0_i32_0 : i32, i32
  }
  func.func @transform_5(%arg0: i32, %arg1: i32) -> (i32, i32) {
    %c0_i32 = arith.constant 0 : i32
    %c0_i32_0 = arith.constant 0 : i32
    return %arg0, %c0_i32 : i32, i32
  }
}

</mosaic_0001>

<bundles_post_ra>
// kernel: tpu_custom_call.1
= control target key start
LH: loop header
LB: loop body
LE: loop exit
PB: predicated region body
PF: predicated region fallthrough
CT: control target
= control target key end

     0   :  { %10 = vsyncpa [#allocation4], 0  ;;  %s645_s0 = inlined_call_operand.hbm [shape: bf16[16,128], index: 0, kind: input, shape index: {}]   ;;  %s646_s1 = inlined_call_operand.hbm [shape: bf16[128,128], index: 1, kind: input, shape index: {}]   ;;  %s647_s2 = inlined_call_operand.vmem [shape: f32[1,128], index: 2, kind: input, shape index: {}]   ;;  %s648_s3 = inlined_call_operand.hbm [shape: bf16[128,128], index: 3, kind: input, shape index: {}]   ;;  %s649_s4 = inlined_call_operand.vmem [shape: f32[1,128], index: 4, kind: input, shape index: {}]   ;;  %s650_s5 = inlined_call_operand.hbm [shape: f32[16,128], index: 5, kind: output, shape index: {}]  }
   0x1   :  { %11 = vsyncpa [#allocation7], 0 }
   0x2   :  { %12 = vsyncpa [#allocation5], 0  ;;  %s535_s18 = smov [#allocation6]   ;;  %s536_s20 = smov [#allocation3]  }
   0x3   :  { %s30_s19 = sshll.u32 %s535_s18, 4  ;;  %s18_s21 = sshll.u32 %s536_s20, 4  ;;  %s31_s19 = int_to_ptr.vmem [resolvable:$true] %s30_s19  ;;  %s575_s21 = int_to_ptr.vmem [resolvable:$true] %s18_s21 }
   0x4   :  { %s441_s24 = scalar_lea.hbm %s646_s1, 1024 }
   0x5   :  { %p442_p0 = scmp.ne.s32.totalorder %s646_s1, %s441_s24  ;;  %p445_p1 = scmp.lt.u32.totalorder %s441_s24, %s646_s1 }
   0x7   :  { %p447_p2 = pnand %p445_p1, %p442_p0 }
   0x9   :  { %450 = shalt.err (!%p447_p2)
}
   0xa   :  { %s451_s29 = scalar_lea.vmem %s31_s19, 1024  ;;  %p456_p4 = scmp.lt.s32.totalorder %s31_s19, %s31_s19 }
   0xb   :  { %p452_p3 = scmp.ne.s32.totalorder %s31_s19, %s451_s29  ;;  %p457_p5 = scmp.lt.s32.totalorder %s451_s29, %s451_s29 }
   0xd   :  { %p458_p6 = por %p457_p5, %p456_p4 }
   0xf   :  { %p459_p7 = pnand %p458_p6, %p452_p3 }
  0x11   :  { %462 = shalt.err (!%p459_p7)
}
  0x12   :  { %s537_s30 = smov 64   ;;  %s538_s6 = smov 4  }
  0x13   :  { %36 = dma.hbm_to_vmem [thread:$0]  %s646_s1, 1024, %s31_s19, [#allocation7], %s537_s30, %s537_s30, %s538_s6  }
  0x14   :  { %s463_s11 = scalar_lea.hbm %s645_s0, 128 }
  0x15   :  { %p464_p8 = scmp.ne.s32.totalorder %s645_s0, %s463_s11  ;;  %p467_p9 = scmp.lt.u32.totalorder %s463_s11, %s645_s0 }
  0x17   :  { %p469_p10 = pnand %p467_p9, %p464_p8 }
  0x19   :  { %472 = shalt.err (!%p469_p10)
}
  0x1a   :  { %s473_s16 = scalar_lea.vmem %s575_s21, 128  ;;  %p478_p12 = scmp.lt.s32.totalorder %s575_s21, %s575_s21 }
  0x1b   :  { %p474_p11 = scmp.ne.s32.totalorder %s575_s21, %s473_s16  ;;  %p479_p13 = scmp.lt.s32.totalorder %s473_s16, %s473_s16 }
  0x1d   :  { %p480_p0 = por %p479_p13, %p478_p12 }
  0x1f   :  { %p481_p1 = pnand %p480_p0, %p474_p11 }
  0x21   :  { %484 = shalt.err (!%p481_p1)
}
  0x22   :  { %24 = dma.hbm_to_vmem [thread:$0]  %s645_s0, 128, %s575_s21, [#allocation4], %s537_s30, %s537_s30, %s538_s6  }
  0x23   :  { %s539_s18 = smov [#allocation8]   ;;  %s485_s23 = scalar_lea.hbm %s648_s3, 1024 }
  0x24   :  { %s44_s19 = sshll.u32 %s539_s18, 4  ;;  %p486_p2 = scmp.ne.s32.totalorder %s648_s3, %s485_s23  ;;  %s45_s19 = int_to_ptr.vmem [resolvable:$true] %s44_s19 }
  0x25   :  { %p489_p3 = scmp.lt.u32.totalorder %s485_s23, %s648_s3 }
  0x27   :  { %p491_p4 = pnand %p489_p3, %p486_p2 }
  0x29   :  { %494 = shalt.err (!%p491_p4)
}
  0x2a   :  { %s495_s28 = scalar_lea.vmem %s45_s19, 1024  ;;  %p500_p6 = scmp.lt.s32.totalorder %s45_s19, %s45_s19 }
  0x2b   :  { %p496_p5 = scmp.ne.s32.totalorder %s45_s19, %s495_s28  ;;  %p501_p7 = scmp.lt.s32.totalorder %s495_s28, %s495_s28 }
  0x2d   :  { %p502_p8 = por %p501_p7, %p500_p6 }
  0x2f   :  { %p503_p9 = pnand %p502_p8, %p496_p5 }
  0x31   :  { %506 = shalt.err (!%p503_p9)
}
  0x32   :  { %50 = dma.hbm_to_vmem [thread:$0]  %s648_s3, 1024, %s45_s19, [#allocation7], %s537_s30, %s537_s30, %s538_s6  }
  0x33   :  { %529 = dma.done.wait [#allocation4], 128  }
  0x34   :  { %530 = vsyncadd [#allocation4], 4294967168 }
  0x35   :  { %531 = dma.done.wait [#allocation7], 2048  }
  0x36   :  { %532 = vsyncadd [#allocation7], 4294965248  ;;  %v540_v0 = vmov 0.0   ;;  %vm541_vm0 = vmmov 0   ;;  %v424_v1 = vld [vmem:[#allocation6] sm:$0xff]   ;;  %v425_v2 = vld [vmem:[#allocation6 + $0x8] sm:$0xff]  }
  0x37   :  { %374 = vmatprep.subr.bf16.mxu0 %v540_v0  ;;  %390 = vmatprep.mubr.msk.bf16.mxu0 %vm541_vm0, %v540_v0  ;;  %v433_v3 = vld [vmem:[#allocation8] sm:$0xff]   ;;  %v426_v4 = vld [vmem:[#allocation6 + $0x10] sm:$0xff]   ;;  %v434_v5 = vld [vmem:[#allocation8 + $0x8] sm:$0xff]   ;;  %s542_s7 = smov [#allocation9]  }
  0x38   :  { %394 = vmatprep.subr.bf16.mxu1 %v540_v0  ;;  %410 = vmatprep.mubr.msk.bf16.mxu1 %vm541_vm0, %v540_v0  ;;  %v427_v6 = vld [vmem:[#allocation6 + $0x18] sm:$0xff]   ;;  %v435_v7 = vld [vmem:[#allocation8 + $0x10] sm:$0xff]   ;;  %v428_v8 = vld [vmem:[#allocation6 + $0x20] sm:$0xff]   ;;  %s324_s8 = sshll.u32 %s542_s7, 4  ;;  %s325_s8 = int_to_ptr.vmem [resolvable:$true] %s324_s8 }
  0x39   :  { %375 = vmatpush3.bf16.xpose.msra.mxu0 %v424_v1  ;;  %395 = vmatpush3.bf16.xpose.msra.mxu1 %v433_v3  ;;  %v436_v9 = vld [vmem:[#allocation8 + $0x18] sm:$0xff]   ;;  %v429_v10 = vld [vmem:[#allocation6 + $0x28] sm:$0xff]   ;;  %v437_v11 = vld [vmem:[#allocation8 + $0x20] sm:$0xff]   ;;  %p512_p11 = scmp.lt.s32.totalorder %s325_s8, %s325_s8 }
  0x3a   :  { %376 = vmatprep.subr.bf16.mxu0 %v540_v0  ;;  %396 = vmatprep.subr.bf16.mxu1 %v540_v0  ;;  %v430_v12 = vld [vmem:[#allocation6 + $0x30] sm:$0xff]   ;;  %v438_v13 = vld [vmem:[#allocation8 + $0x28] sm:$0xff]   ;;  %v431_v14 = vld [vmem:[#allocation6 + $0x38] sm:$0xff]  }
  0x3b   :  { %v439_v15 = vld [vmem:[#allocation8 + $0x30] sm:$0xff]   ;;  %v432_v16 = vld [vmem:[#allocation3] sm:$0xff]  }
  0x3c   :  { %v440_v17 = vld [vmem:[#allocation8 + $0x38] sm:$0xff]  }
  0x3d   :  { %v337_v18 = vld [vmem:[%s647_s2] ss:$0 sm:$0xff]  ;;  %s507_s2 = scalar_lea.vmem %s325_s8, 256 }
  0x3e   :  { %v355_v28 = vld [vmem:[%s649_s4] ss:$0 sm:$0xff]  ;;  %p508_p10 = scmp.ne.s32.totalorder %s325_s8, %s507_s2  ;;  %p513_p12 = scmp.lt.s32.totalorder %s507_s2, %s507_s2 }
  0x40   :  { %p514_p13 = por %p513_p12, %p512_p11 }
  0x41   :  { %377 = vmatpush3.bf16.xpose.msra.mxu0 %v425_v2  ;;  %397 = vmatpush3.bf16.xpose.msra.mxu1 %v434_v5 }
  0x42   :  { %378 = vmatprep.subr.bf16.mxu0 %v540_v0  ;;  %398 = vmatprep.subr.bf16.mxu1 %v540_v0  ;;  %p515_p0 = pnand %p514_p13, %p508_p10 }
  0x49   :  { %379 = vmatpush3.bf16.xpose.msra.mxu0 %v426_v4  ;;  %399 = vmatpush3.bf16.xpose.msra.mxu1 %v435_v7 }
  0x4a   :  { %380 = vmatprep.subr.bf16.mxu0 %v540_v0  ;;  %400 = vmatprep.subr.bf16.mxu1 %v540_v0 }
  0x51   :  { %381 = vmatpush3.bf16.xpose.msra.mxu0 %v427_v6  ;;  %401 = vmatpush3.bf16.xpose.msra.mxu1 %v436_v9 }
  0x52   :  { %382 = vmatprep.subr.bf16.mxu0 %v540_v0  ;;  %402 = vmatprep.subr.bf16.mxu1 %v540_v0 }
  0x59   :  { %383 = vmatpush3.bf16.xpose.msra.mxu0 %v428_v8  ;;  %403 = vmatpush3.bf16.xpose.msra.mxu1 %v437_v11 }
  0x5a   :  { %384 = vmatprep.subr.bf16.mxu0 %v540_v0  ;;  %404 = vmatprep.subr.bf16.mxu1 %v540_v0 }
  0x61   :  { %385 = vmatpush3.bf16.xpose.msra.mxu0 %v429_v10  ;;  %405 = vmatpush3.bf16.xpose.msra.mxu1 %v438_v13 }
  0x62   :  { %386 = vmatprep.subr.bf16.mxu0 %v540_v0  ;;  %406 = vmatprep.subr.bf16.mxu1 %v540_v0 }
  0x69   :  { %387 = vmatpush3.bf16.xpose.msra.mxu0 %v430_v12  ;;  %407 = vmatpush3.bf16.xpose.msra.mxu1 %v439_v15 }
  0x6a   :  { %388 = vmatprep.subr.bf16.mxu0 %v540_v0  ;;  %408 = vmatprep.subr.bf16.mxu1 %v540_v0 }
  0x71   :  { %389 = vmatpush3.bf16.xpose.msra.mxu0 %v431_v14  ;;  %409 = vmatpush3.bf16.xpose.msra.mxu1 %v440_v17 }
  0x78   :  { %391 = vmatmul.mubr.bf16.vlgmr.msra.gmra.mrb[0].mxu0 %v432_v16 }
 0x14b   :  { %v182_v19 = vpop.f32.mrb[0].mxu0 }
 0x14c   :  { %v183_v20 = vadd.f32 %v337_v18, %v182_v19  ;;  %v392_v21 = vpop.f32.mrb[1].mxu0 }
 0x14d   :  { %v185_v22 = vpop.f32.mrb[2].mxu0 }
 0x14e   :  { %v186_v23 = vadd.f32 %v337_v18, %v185_v22  ;;  %v393_v24 = vpop.f32.mrb[3].mxu0  ;;  %v189_v25 = vmax.f32 %v183_v20, 0.0 }
 0x150   :  { %v190_v26 = vmax.f32 %v186_v23, 0.0 }
 0x152   :  { %v193_v27 = vpack.c.bf16 %v190_v26, %v189_v25 }
 0x154   :  { %411 = vmatmul.mubr.bf16.vlgmr.msra.gmra.mrb[0].mxu1 %v193_v27 }
 0x227   :  { %v292_v29 = vpop.f32.mrb[0].mxu1 }
 0x228   :  { %v315_v30 = vadd.f32 %v355_v28, %v292_v29  ;;  %v412_v31 = vpop.f32.mrb[1].mxu1 }
 0x229   :  { %v295_v32 = vpop.f32.mrb[2].mxu1 }
 0x22a   :  { %317 = vst [vmem:[#allocation9] sm:$0xff] %v315_v30  ;;  %v316_v33 = vadd.f32 %v355_v28, %v295_v32  ;;  %v413_v34 = vpop.f32.mrb[3].mxu1 }
 0x22c   :  { %318 = vst [vmem:[#allocation9 + $0x8] sm:$0xff] %v316_v33 }
 0x22d   :  { %518 = shalt.err (!%p515_p0)
}
 0x22e   :  { %s519_s10 = scalar_lea.hbm %s650_s5, 256 }
 0x22f   :  { %p520_p1 = scmp.ne.s32.totalorder %s650_s5, %s519_s10  ;;  %p523_p2 = scmp.lt.u32.totalorder %s519_s10, %s650_s5 }
 0x231   :  { %p525_p3 = pnand %p523_p2, %p520_p1 }
 0x233   :  { %528 = shalt.err (!%p525_p3)
}
 0x234   :  { %s543_s15 = smov 128   ;;  %s544_s16 = smov 8  }
 0x235   :  { %330 = dma.vmem_to_hbm [thread:$0]  %s325_s8, 256, %s650_s5, [#allocation5], %s543_s15, %s543_s15, %s544_s16  }
 0x236   :  { %533 = dma.done.wait [#allocation5], 256  }
 0x237   :  { %534 = vsyncadd [#allocation5], 4294967040 }
 0x238   :  { %334 = vsyncpa [#allocation4], 1 }
 0x239   :  { %335 = vsyncpa [#allocation7], 1 }
 0x23a   :  { %336 = vsyncpa [#allocation5], 1 }

</bundles_post_ra>
